<compile_context>
chip_gen: v7x
topology: tpu7x:2x2x1
jax: 0.10.0
libtpu: 0.0.40
codegen_flags: <defaults>
</compile_context>

<pallas_src>
import jax
import jax.numpy as jnp
from jax.experimental import pallas as pl
from jax.experimental.pallas import tpu as pltpu


# ----------------------------- Pallas kernel -------------------------------

def mlp_kernel(x_ref, w1_ref, b1_ref, w2_ref, b2_ref, w3_ref, b3_ref, o_ref):
    """Fused 3-layer MLP (conv1x1 + eval-BN pre-folded into layer 1).

    x_ref : (BT, C_in*L)   f32 activations (one batch tile, natural layout)
    w*_ref: bf16 weights, (in, out) layout; b*_ref: (1, out) f32
    o_ref : (BT, out_pad)  f32
    """
    x = x_ref[...].astype(w1_ref.dtype)          # in-register f32 -> bf16 cast
    h = jnp.dot(x, w1_ref[...], preferred_element_type=jnp.float32)
    h = jnp.maximum(h + b1_ref[...], 0.0)
    # TODO(synk): Dropout(0.5) is identity in eval mode; training-mode
    #             stochastic masking is not implemented here.
    h = jnp.dot(h.astype(w2_ref.dtype), w2_ref[...],
                preferred_element_type=jnp.float32)
    h = jnp.maximum(h + b2_ref[...], 0.0)
    o = jnp.dot(h.astype(w3_ref.dtype), w3_ref[...],
                preferred_element_type=jnp.float32)
    o_ref[...] = o + b3_ref[...]


# ------------------------- one-time parameter packing ----------------------

def pack_fc_block_params(params, eps=1e-5, weight_dtype=jnp.bfloat16):
    """Fold conv1x1 + eval-BN into fc1; transpose/cast all weights once.

    The folded fc1 weight rows are ordered (ci, l) so that the activation can
    be fed as x.reshape(B, C_in*L) — a zero-copy reshape of the PyTorch NCL
    layout — with no wrapper-side transpose.
    """
    wp = params["wp"]                                   # (128, C_in)
    prep_c, c_in = wp.shape
    fc1_w = params["fc1_w"]                             # (fc_dim, 128*L)
    fc_dim = fc1_w.shape[0]
    L = fc1_w.shape[1] // prep_c
    out_c = params["fc3_w"].shape[0]

    scale = params["bn_gamma"] / jnp.sqrt(params["bn_var"] + eps)     # (128,)
    bias = params["bn_beta"] - params["bn_mean"] * scale              # (128,)

    # PyTorch flatten of (B, 128, L) has column index c*L + l, so
    # fc1_w.reshape(fc_dim, 128, L)[o, c, l] == fc1_w[o, c*L + l].
    fc1_w_r = fc1_w.reshape(fc_dim, prep_c, L)          # [o, c, l]
    wp_scaled = wp * scale[:, None]                     # [c, ci]
    # W1_eff[(ci, l), o] = sum_c fc1_w_r[o, c, l] * scale[c] * wp[c, ci]
    # Row order (ci, l) matches x[b].reshape(C_in*L) of the NCL input.
    w1_eff = jnp.einsum("ocl,ck->klo", fc1_w_r, wp_scaled)   # (C_in, L, fc_dim)
    w1_eff = w1_eff.reshape(c_in * L, fc_dim)
    b1_eff = params["fc1_b"] + jnp.einsum("ocl,c->o", fc1_w_r, bias)

    w2 = jnp.transpose(params["fc2_w"], (1, 0))         # (fc_dim, fc_dim)
    w3 = jnp.transpose(params["fc3_w"], (1, 0))         # (fc_dim, out_c)

    # Pad the output lane dim to a multiple of 128 (unmasked stores).
    out_c_pad = ((out_c + 127) // 128) * 128
    w3p = jnp.zeros((fc_dim, out_c_pad), w3.dtype).at[:, :out_c].set(w3)
    b3p = jnp.zeros((out_c_pad,), jnp.float32).at[:out_c].set(params["fc3_b"])

    return {
        "w1": w1_eff.astype(weight_dtype),
        "b1": b1_eff.reshape(1, fc_dim).astype(jnp.float32),
        "w2": w2.astype(weight_dtype),
        "b2": params["fc2_b"].reshape(1, fc_dim).astype(jnp.float32),
        "w3": w3p.astype(weight_dtype),
        "b3": b3p.reshape(1, out_c_pad).astype(jnp.float32),
        "meta": (int(c_in), int(L), int(out_c)),
    }


# ----------------------------- tile selection -------------------------------

def _choose_batch_tile(b):
    """Batch tile: big enough to amortize ~0.35us/grid-step and fill the
    256-wide MXU (v6e/v7x), small enough to keep >=2 grid steps for v7x's
    two TensorCores when B permits."""
    if b <= 256:
        return max(16, ((b + 15) // 16) * 16)   # single sublane-aligned tile
    if b <= 1024:
        return 256                              # 2-4 grid steps
    return 512                                  # large B: amortize overhead


# ------------------------------ JAX wrapper --------------------------------

def fc_block_forward(x, packed):
    """x: (B, C_in, L) float32 (PyTorch NCL). Returns (B, out_channel) f32."""
    c_in, L, out_c = packed["meta"]
    B = x.shape[0]
    k1 = c_in * L
    fc_dim = packed["w1"].shape[1]
    out_c_pad = packed["w3"].shape[1]

    # Zero-copy flatten of the contiguous NCL layout (no transpose, no cast).
    xin = x.reshape(B, k1)

    bt = _choose_batch_tile(B)
    b_pad = ((B + bt - 1) // bt) * bt
    if b_pad != B:
        xin = jnp.pad(xin, ((0, b_pad - B), (0, 0)))

    out = pl.pallas_call(
        mlp_kernel,
        out_shape=jax.ShapeDtypeStruct((b_pad, out_c_pad), jnp.float32),
        grid=(b_pad // bt,),
        in_specs=[
            pl.BlockSpec((bt, k1), lambda i: (i, 0)),          # activations (f32)
            pl.BlockSpec((k1, fc_dim), lambda i: (0, 0)),      # weights: constant
            pl.BlockSpec((1, fc_dim), lambda i: (0, 0)),       # index_map -> DMA'd
            pl.BlockSpec((fc_dim, fc_dim), lambda i: (0, 0)),  # once, reused across
            pl.BlockSpec((1, fc_dim), lambda i: (0, 0)),       # batch tiles
            pl.BlockSpec((fc_dim, out_c_pad), lambda i: (0, 0)),
            pl.BlockSpec((1, out_c_pad), lambda i: (0, 0)),
        ],
        out_specs=pl.BlockSpec((bt, out_c_pad), lambda i: (i, 0)),
        compiler_params=pltpu.CompilerParams(
            dimension_semantics=("parallel",)),
    )(xin, packed["w1"], packed["b1"], packed["w2"], packed["b2"],
      packed["w3"], packed["b3"])

    return out[:B, :out_c]


# ------------------------------ references ---------------------------------

def fc_block_reference(x, params):
    """Pure-JAX f32 mirror of the PyTorch forward (eval mode)."""
    B = x.shape[0]
    eps = 1e-5
    y = jnp.einsum("bcl,oc->bol", x, params["wp"])                 # Conv1d k=1
    y = ((y - params["bn_mean"][None, :, None])
         / jnp.sqrt(params["bn_var"] + eps)[None, :, None]
         * params["bn_gamma"][None, :, None]
         + params["bn_beta"][None, :, None])                       # BN (eval)
    xf = y.reshape(B, -1)                                          # c*L + l flatten
    h = jnp.maximum(xf @ params["fc1_w"].T + params["fc1_b"], 0.0)
    h = jnp.maximum(h @ params["fc2_w"].T + params["fc2_b"], 0.0)
    return h @ params["fc3_w"].T + params["fc3_b"]


def fc_block_reference_packed(x, packed):
    """Pure-JAX mirror of the kernel using the same packed bf16 weights."""
    c_in, L, out_c = packed["meta"]
    B = x.shape[0]
    xin = x.reshape(B, c_in * L).astype(packed["w1"].dtype)
    h = jnp.dot(xin, packed["w1"], preferred_element_type=jnp.float32) + packed["b1"]
    h = jnp.maximum(h, 0.0)
    h = jnp.dot(h.astype(packed["w2"].dtype), packed["w2"],
                preferred_element_type=jnp.float32) + packed["b2"]
    h = jnp.maximum(h, 0.0)
    o = jnp.dot(h.astype(packed["w3"].dtype), packed["w3"],
                preferred_element_type=jnp.float32) + packed["b3"]
    return o[:, :out_c]


# --------------------------------- main -------------------------------------

if __name__ == "__main__":
    # Small shapes consistent with the module.
    B, in_channel, in_dim, out_channel = 2, 4, 16, 8
    prep_channel, fc_dim = 128, 512

    key = jax.random.PRNGKey(0)
    ks = jax.random.split(key, 12)

    def u(k, shape, fan_in):
        bound = 1.0 / jnp.sqrt(fan_in)
        return jax.random.uniform(k, shape, jnp.float32, -bound, bound)

    params = {
        # Conv1d(in_channel, 128, kernel_size=1, bias=False): weight (128, in_channel)
        "wp": u(ks[0], (prep_channel, in_channel), in_channel),
        # BatchNorm1d(128) eval-mode stats/affine (deterministic, non-trivial)
        "bn_gamma": 1.0 + 0.1 * jax.random.normal(ks[1], (prep_channel,), jnp.float32),
        "bn_beta": 0.1 * jax.random.normal(ks[2], (prep_channel,), jnp.float32),
        "bn_mean": 0.1 * jax.random.normal(ks[3], (prep_channel,), jnp.float32),
        "bn_var": 1.0 + 0.1 * jax.random.uniform(ks[4], (prep_channel,), jnp.float32),
        # Linear(128*in_dim, 512)
        "fc1_w": u(ks[5], (fc_dim, prep_channel * in_dim), prep_channel * in_dim),
        "fc1_b": u(ks[6], (fc_dim,), prep_channel * in_dim),
        # Linear(512, 512)
        "fc2_w": u(ks[7], (fc_dim, fc_dim), fc_dim),
        "fc2_b": u(ks[8], (fc_dim,), fc_dim),
        # Linear(512, out_channel)
        "fc3_w": u(ks[9], (out_channel, fc_dim), fc_dim),
        "fc3_b": u(ks[10], (out_channel,), fc_dim),
    }

    x = jax.random.normal(ks[11], (B, in_channel, in_dim), jnp.float32)  # NCL

    # One-time parameter packing (conv+BN fold, transposes, bf16 cast).
    packed = pack_fc_block_params(params)

    out = fc_block_forward(x, packed)
    out = jax.block_until_ready(out)
    assert out.shape == (B, out_channel)

    # 1) Tight check against a pure-JAX run of the *same* packed bf16 weights
    #    (validates the kernel / tiling itself).
    ref_packed = fc_block_reference_packed(x, packed)
    err_k = jnp.max(jnp.abs(out - ref_packed))
    assert jnp.allclose(out, ref_packed, atol=1e-3, rtol=1e-3), (
        f"kernel vs packed-ref max abs err {err_k}")

    # 2) Check against the f32 PyTorch-mirror reference (validates the
    #    conv+BN fold); tolerance loosened for bf16 weights/activations.
    ref = fc_block_reference(x, params)
    err_f = jnp.max(jnp.abs(out - ref))
    assert jnp.allclose(out, ref, atol=2e-2, rtol=2e-2), (
        f"kernel vs f32-ref max abs err {err_f}")

    print("KERNEL_OK")
</pallas_src>

<mosaic_0001>
module attributes {stable_mosaic.version = 11 : i64} {
  func.func @mlp_kernel(%arg0: i32, %arg1: memref<16x64xf32, #tpu.memory_space<vmem>>, %arg2: memref<64x512xbf16, #tpu.memory_space<vmem>>, %arg3: memref<1x512xf32, #tpu.memory_space<vmem>>, %arg4: memref<512x512xbf16, #tpu.memory_space<vmem>>, %arg5: memref<1x512xf32, #tpu.memory_space<vmem>>, %arg6: memref<512x128xbf16, #tpu.memory_space<vmem>>, %arg7: memref<1x128xf32, #tpu.memory_space<vmem>>, %arg8: memref<16x128xf32, #tpu.memory_space<vmem>>) attributes {dimension_semantics = [#tpu.dimension_semantics<parallel>], iteration_bounds = array<i64: 1>, scalar_prefetch = 0 : i64, scratch_operands = 0 : i64, tpu.core_type = #tpu.core_type<tc>, window_params = [{transform_indices = @transform_0, window_bounds = array<i64: 16, 64>}, {pipeline_mode = #tpu.pipeline_mode<synchronous>, transform_indices = @transform_1, window_bounds = array<i64: 64, 512>}, {pipeline_mode = #tpu.pipeline_mode<synchronous>, transform_indices = @transform_2, window_bounds = array<i64: 1, 512>}, {pipeline_mode = #tpu.pipeline_mode<synchronous>, transform_indices = @transform_3, window_bounds = array<i64: 512, 512>}, {pipeline_mode = #tpu.pipeline_mode<synchronous>, transform_indices = @transform_4, window_bounds = array<i64: 1, 512>}, {pipeline_mode = #tpu.pipeline_mode<synchronous>, transform_indices = @transform_5, window_bounds = array<i64: 512, 128>}, {pipeline_mode = #tpu.pipeline_mode<synchronous>, transform_indices = @transform_6, window_bounds = array<i64: 1, 128>}, {transform_indices = @transform_7, window_bounds = array<i64: 16, 128>}]} {
    %c0 = arith.constant 0 : index
    %c0_0 = arith.constant 0 : index
    %0 = vector.load %arg1[%c0, %c0_0] : memref<16x64xf32, #tpu.memory_space<vmem>>, vector<16x64xf32>
    %1 = arith.truncf %0 : vector<16x64xf32> to vector<16x64xbf16>
    %c0_1 = arith.constant 0 : index
    %c0_2 = arith.constant 0 : index
    %2 = vector.load %arg2[%c0_1, %c0_2] : memref<64x512xbf16, #tpu.memory_space<vmem>>, vector<64x512xbf16>
    %cst = arith.constant dense<0.000000e+00> : vector<16x512xf32>
    %3 = tpu.matmul %1, %2, %cst {dimension_numbers = #tpu.dot_dimension_numbers<[1], [0], [0], [1], [0, 0, 1, 1], [], []>} : vector<16x64xbf16>, vector<64x512xbf16>, vector<16x512xf32> -> vector<16x512xf32>
    %c0_3 = arith.constant 0 : index
    %c0_4 = arith.constant 0 : index
    %4 = vector.load %arg3[%c0_3, %c0_4] : memref<1x512xf32, #tpu.memory_space<vmem>>, vector<1x512xf32>
    %5 = vector.broadcast %4 : vector<1x512xf32> to vector<16x512xf32>
    %6 = arith.addf %3, %5 : vector<16x512xf32>
    %cst_5 = arith.constant 0.000000e+00 : f32
    %7 = vector.broadcast %cst_5 : f32 to vector<16x512xf32>
    %8 = arith.maximumf %6, %7 : vector<16x512xf32>
    %9 = arith.truncf %8 : vector<16x512xf32> to vector<16x512xbf16>
    %c0_6 = arith.constant 0 : index
    %c0_7 = arith.constant 0 : index
    %10 = vector.load %arg4[%c0_6, %c0_7] : memref<512x512xbf16, #tpu.memory_space<vmem>>, vector<512x512xbf16>
    %cst_8 = arith.constant dense<0.000000e+00> : vector<16x512xf32>
    %11 = tpu.matmul %9, %10, %cst_8 {dimension_numbers = #tpu.dot_dimension_numbers<[1], [0], [0], [1], [0, 0, 1, 1], [], []>} : vector<16x512xbf16>, vector<512x512xbf16>, vector<16x512xf32> -> vector<16x512xf32>
    %c0_9 = arith.constant 0 : index
    %c0_10 = arith.constant 0 : index
    %12 = vector.load %arg5[%c0_9, %c0_10] : memref<1x512xf32, #tpu.memory_space<vmem>>, vector<1x512xf32>
    %13 = vector.broadcast %12 : vector<1x512xf32> to vector<16x512xf32>
    %14 = arith.addf %11, %13 : vector<16x512xf32>
    %cst_11 = arith.constant 0.000000e+00 : f32
    %15 = vector.broadcast %cst_11 : f32 to vector<16x512xf32>
    %16 = arith.maximumf %14, %15 : vector<16x512xf32>
    %17 = arith.truncf %16 : vector<16x512xf32> to vector<16x512xbf16>
    %c0_12 = arith.constant 0 : index
    %c0_13 = arith.constant 0 : index
    %18 = vector.load %arg6[%c0_12, %c0_13] : memref<512x128xbf16, #tpu.memory_space<vmem>>, vector<512x128xbf16>
    %cst_14 = arith.constant dense<0.000000e+00> : vector<16x128xf32>
    %19 = tpu.matmul %17, %18, %cst_14 {dimension_numbers = #tpu.dot_dimension_numbers<[1], [0], [0], [1], [0, 0, 1, 1], [], []>} : vector<16x512xbf16>, vector<512x128xbf16>, vector<16x128xf32> -> vector<16x128xf32>
    %c0_15 = arith.constant 0 : index
    %c0_16 = arith.constant 0 : index
    %20 = vector.load %arg7[%c0_15, %c0_16] : memref<1x128xf32, #tpu.memory_space<vmem>>, vector<1x128xf32>
    %21 = vector.broadcast %20 : vector<1x128xf32> to vector<16x128xf32>
    %22 = arith.addf %19, %21 : vector<16x128xf32>
    %c0_17 = arith.constant 0 : index
    %c0_18 = arith.constant 0 : index
    %23 = vector.load %arg8[%c0_17, %c0_18] : memref<16x128xf32, #tpu.memory_space<vmem>>, vector<16x128xf32>
    tpu.vector_store %arg8[%c0_17, %c0_18], %22 {strides = array<i32>} : memref<16x128xf32, #tpu.memory_space<vmem>>, vector<16x128xf32>,
    return
  }
  func.func @transform_0(%arg0: i32) -> (i32, i32) {
    %c0_i32 = arith.constant 0 : i32
    %c0_i32_0 = arith.constant 0 : i32
    return %arg0, %c0_i32 : i32, i32
  }
  func.func @transform_1(%arg0: i32) -> (i32, i32) {
    %c0_i32 = arith.constant 0 : i32
    %c0_i32_0 = arith.constant 0 : i32
    %c0_i32_1 = arith.constant 0 : i32
    return %c0_i32, %c0_i32_0 : i32, i32
  }
  func.func @transform_2(%arg0: i32) -> (i32, i32) {
    %c0_i32 = arith.constant 0 : i32
    %c0_i32_0 = arith.constant 0 : i32
    %c0_i32_1 = arith.constant 0 : i32
    return %c0_i32, %c0_i32_0 : i32, i32
  }
  func.func @transform_3(%arg0: i32) -> (i32, i32) {
    %c0_i32 = arith.constant 0 : i32
    %c0_i32_0 = arith.constant 0 : i32
    %c0_i32_1 = arith.constant 0 : i32
    return %c0_i32, %c0_i32_0 : i32, i32
  }
  func.func @transform_4(%arg0: i32) -> (i32, i32) {
    %c0_i32 = arith.constant 0 : i32
    %c0_i32_0 = arith.constant 0 : i32
    %c0_i32_1 = arith.constant 0 : i32
    return %c0_i32, %c0_i32_0 : i32, i32
  }
  func.func @transform_5(%arg0: i32) -> (i32, i32) {
    %c0_i32 = arith.constant 0 : i32
    %c0_i32_0 = arith.constant 0 : i32
    %c0_i32_1 = arith.constant 0 : i32
    return %c0_i32, %c0_i32_0 : i32, i32
  }
  func.func @transform_6(%arg0: i32) -> (i32, i32) {
    %c0_i32 = arith.constant 0 : i32
    %c0_i32_0 = arith.constant 0 : i32
    %c0_i32_1 = arith.constant 0 : i32
    return %c0_i32, %c0_i32_0 : i32, i32
  }
  func.func @transform_7(%arg0: i32) -> (i32, i32) {
    %c0_i32 = arith.constant 0 : i32
    %c0_i32_0 = arith.constant 0 : i32
    return %arg0, %c0_i32 : i32, i32
  }
}

</mosaic_0001>

<bundles_post_ra>
// kernel: tpu_custom_call.1
= control target key start
LH: loop header
LB: loop body
LE: loop exit
PB: predicated region body
PF: predicated region fallthrough
CT: control target
= control target key end

     0   :  { %12 = vsyncpa [#allocation3], 0  ;;  %s2431_s0 = inlined_call_operand.hbm [shape: f32[16,64], index: 0, kind: input, shape index: {}]   ;;  %s2432_s1 = inlined_call_operand.hbm [shape: bf16[64,512], index: 1, kind: input, shape index: {}]   ;;  %s2433_s2 = inlined_call_operand.vmem [shape: f32[1,512], index: 2, kind: input, shape index: {}]   ;;  %s2434_s3 = inlined_call_operand.hbm [shape: bf16[512,512], index: 3, kind: input, shape index: {}]   ;;  %s2435_s4 = inlined_call_operand.vmem [shape: f32[1,512], index: 4, kind: input, shape index: {}]   ;;  %s2436_s5 = inlined_call_operand.hbm [shape: bf16[512,128], index: 5, kind: input, shape index: {}]   ;;  %s2437_s6 = inlined_call_operand.vmem [shape: f32[1,128], index: 6, kind: input, shape index: {}]   ;;  %s2438_s7 = inlined_call_operand.hbm [shape: f32[16,128], index: 7, kind: output, shape index: {}]  }
   0x1   :  { %13 = vsyncpa [#allocation6], 0 }
   0x2   :  { %14 = vsyncpa [#allocation9], 0 }
   0x3   :  { %15 = vsyncpa [#allocation4], 0  ;;  %s2263_s24 = smov [#allocation5]   ;;  %s2145_s28 = scalar_lea.hbm %s2432_s1, 2048 }
   0x4   :  { %s33_s25 = sshll.u32 %s2263_s24, 4  ;;  %p2146_p0 = scmp.ne.s32.totalorder %s2432_s1, %s2145_s28  ;;  %s34_s25 = int_to_ptr.vmem [resolvable:$true] %s33_s25 }
   0x5   :  { %p2149_p1 = scmp.lt.u32.totalorder %s2145_s28, %s2432_s1 }
   0x7   :  { %p2151_p2 = pnand %p2149_p1, %p2146_p0 }
   0x9   :  { %2154 = shalt.err (!%p2151_p2)
}
   0xa   :  { %s2155_s10 = scalar_lea.vmem %s34_s25, 2048  ;;  %p2160_p4 = scmp.lt.s32.totalorder %s34_s25, %s34_s25 }
   0xb   :  { %p2156_p3 = scmp.ne.s32.totalorder %s34_s25, %s2155_s10  ;;  %p2161_p5 = scmp.lt.s32.totalorder %s2155_s10, %s2155_s10 }
   0xd   :  { %p2162_p6 = por %p2161_p5, %p2160_p4 }
   0xf   :  { %p2163_p7 = pnand %p2162_p6, %p2156_p3 }
  0x11   :  { %2166 = shalt.err (!%p2163_p7)
}
  0x12   :  { %s2264_s11 = smov 256   ;;  %s2265_s12 = smov 16  }
  0x13   :  { %39 = dma.hbm_to_vmem [thread:$0]  %s2432_s1, 2048, %s34_s25, [#allocation6], %s2264_s11, %s2264_s11, %s2265_s12  }
  0x14   :  { %s2266_s15 = smov [#allocation2]   ;;  %s2167_s19 = scalar_lea.hbm %s2431_s0, 256 }
  0x15   :  { %s21_s16 = sshll.u32 %s2266_s15, 4  ;;  %p2168_p8 = scmp.ne.s32.totalorder %s2431_s0, %s2167_s19  ;;  %s22_s16 = int_to_ptr.vmem [resolvable:$true] %s21_s16 }
  0x16   :  { %p2171_p9 = scmp.lt.u32.totalorder %s2167_s19, %s2431_s0 }
  0x18   :  { %p2173_p10 = pnand %p2171_p9, %p2168_p8 }
  0x1a   :  { %2176 = shalt.err (!%p2173_p10)
}
  0x1b   :  { %s2177_s24 = scalar_lea.vmem %s22_s16, 256  ;;  %p2182_p12 = scmp.lt.s32.totalorder %s22_s16, %s22_s16 }
  0x1c   :  { %p2178_p11 = scmp.ne.s32.totalorder %s22_s16, %s2177_s24  ;;  %p2183_p13 = scmp.lt.s32.totalorder %s2177_s24, %s2177_s24 }
  0x1e   :  { %p2184_p0 = por %p2183_p13, %p2182_p12 }
  0x20   :  { %p2185_p1 = pnand %p2184_p0, %p2178_p11 }
  0x22   :  { %2188 = shalt.err (!%p2185_p1)
}
  0x23   :  { %s2267_s1 = smov 128   ;;  %s2268_s25 = smov 8  }
  0x24   :  { %27 = dma.hbm_to_vmem [thread:$0]  %s2431_s0, 256, %s22_s16, [#allocation3], %s2267_s1, %s2267_s1, %s2268_s25  }
  0x25   :  { %s2269_s28 = smov [#allocation7]   ;;  %s2270_s30 = smov [#allocation8]  }
  0x26   :  { %s47_s29 = sshll.u32 %s2269_s28, 4  ;;  %s61_s8 = sshll.u32 %s2270_s30, 4  ;;  %s48_s29 = int_to_ptr.vmem [resolvable:$true] %s47_s29  ;;  %s2345_s8 = int_to_ptr.vmem [resolvable:$true] %s61_s8 }
  0x27   :  { %s2189_s13 = scalar_lea.hbm %s2434_s3, 16384 }
  0x28   :  { %p2190_p2 = scmp.ne.s32.totalorder %s2434_s3, %s2189_s13  ;;  %p2193_p3 = scmp.lt.u32.totalorder %s2189_s13, %s2434_s3 }
  0x2a   :  { %p2195_p4 = pnand %p2193_p3, %p2190_p2 }
  0x2c   :  { %2198 = shalt.err (!%p2195_p4)
}
  0x2d   :  { %s2199_s0 = scalar_lea.vmem %s48_s29, 16384  ;;  %p2204_p6 = scmp.lt.s32.totalorder %s48_s29, %s48_s29 }
  0x2e   :  { %p2200_p5 = scmp.ne.s32.totalorder %s48_s29, %s2199_s0  ;;  %p2205_p7 = scmp.lt.s32.totalorder %s2199_s0, %s2199_s0 }
  0x30   :  { %p2206_p8 = por %p2205_p7, %p2204_p6 }
  0x32   :  { %p2207_p9 = pnand %p2206_p8, %p2200_p5 }
  0x34   :  { %2210 = shalt.err (!%p2207_p9)
}
  0x35   :  { %53 = dma.hbm_to_vmem [thread:$0]  %s2434_s3, 16384, %s48_s29, [#allocation6], %s2264_s11, %s2264_s11, %s2265_s12  }
  0x36   :  { %s2211_s22 = scalar_lea.hbm %s2436_s5, 4096 }
  0x37   :  { %p2212_p10 = scmp.ne.s32.totalorder %s2436_s5, %s2211_s22  ;;  %p2215_p11 = scmp.lt.u32.totalorder %s2211_s22, %s2436_s5 }
  0x39   :  { %p2217_p12 = pnand %p2215_p11, %p2212_p10 }
  0x3b   :  { %2220 = shalt.err (!%p2217_p12)
}
  0x3c   :  { %s2221_s28 = scalar_lea.vmem %s2345_s8, 4096  ;;  %p2226_p0 = scmp.lt.s32.totalorder %s2345_s8, %s2345_s8 }
  0x3d   :  { %p2222_p13 = scmp.ne.s32.totalorder %s2345_s8, %s2221_s28  ;;  %p2227_p1 = scmp.lt.s32.totalorder %s2221_s28, %s2221_s28 }
  0x3f   :  { %p2228_p2 = por %p2227_p1, %p2226_p0 }
  0x41   :  { %p2229_p3 = pnand %p2228_p2, %p2222_p13 }
  0x43   :  { %2232 = shalt.err (!%p2229_p3)
}
  0x44   :  { %s2271_s3 = smov 64   ;;  %s2272_s11 = smov 4  }
  0x45   :  { %67 = dma.hbm_to_vmem [thread:$0]  %s2436_s5, 4096, %s2345_s8, [#allocation9], %s2271_s3, %s2271_s3, %s2272_s11  }
  0x46   :  { %2255 = dma.done.wait [#allocation3], 256  }
  0x47   :  { %2256 = vsyncadd [#allocation3], 4294967040 }
  0x48   :  { %2257 = dma.done.wait [#allocation6], 18432  }
  0x49   :  { %2258 = vsyncadd [#allocation6], 4294948864 }
  0x4a   :  { %2259 = dma.done.wait [#allocation9], 4096  }
  0x4b   :  { %2260 = vsyncadd [#allocation9], 4294963200  ;;  %v2273_v0 = vmov 0   ;;  %v1897_v1 = vld [vmem:[#allocation5 + $0x4] ss:$16 sps:$4 sm:$0xff]   ;;  %v84_v15 = vld [vmem:[#allocation2 + $0x8] sm:$0xff] }
  0x4c   :  { %240 = vmatprep.mubr.bf16.mxu0 %v2273_v0  ;;  %283 = vmatprep.mubr.bf16.mxu1 %v2273_v0  ;;  %v1899_v2 = vld [vmem:[#allocation5] ss:$16 sps:$4 sm:$0xff]   ;;  %v1900_v3 = vld [vmem:[#allocation5 + $0x24] ss:$16 sps:$4 sm:$0xff]   ;;  %v1909_v7 = vld [vmem:[#allocation5 + $0xc] ss:$16 sps:$4 sm:$0xff]  }
  0x4d   :  { %208 = vmatprep.subr.bf16.mxu0 %v1897_v1  ;;  %v1902_v4 = vld [vmem:[#allocation5 + $0x20] ss:$16 sps:$4 sm:$0xff]   ;;  %v1903_v5 = vld [vmem:[#allocation5 + $0x44] ss:$16 sps:$4 sm:$0xff]   ;;  %v1911_v8 = vld [vmem:[#allocation5 + $0x8] ss:$16 sps:$4 sm:$0xff]   ;;  %251 = vmatprep.subr.bf16.mxu1 %v1909_v7 }
  0x4e   :  { %209 = vmatpush1.bf16.msra.mxu0 %v1899_v2  ;;  %v1905_v6 = vld [vmem:[#allocation5 + $0x40] ss:$16 sps:$4 sm:$0xff]   ;;  %v1906_v9 = vld [vmem:[#allocation5 + $0x64] ss:$16 sps:$4 sm:$0xff]   ;;  %v1912_v10 = vld [vmem:[#allocation5 + $0x2c] ss:$16 sps:$4 sm:$0xff]   ;;  %252 = vmatpush1.bf16.msra.mxu1 %v1911_v8 }
  0x4f   :  { %210 = vmatprep.subr.bf16.mxu0 %v1900_v3  ;;  %v1908_v11 = vld [vmem:[#allocation5 + $0x60] ss:$16 sps:$4 sm:$0xff]   ;;  %v1914_v13 = vld [vmem:[#allocation5 + $0x28] ss:$16 sps:$4 sm:$0xff]   ;;  %253 = vmatprep.subr.bf16.mxu1 %v1912_v10  ;;  %v1915_v14 = vld [vmem:[#allocation5 + $0x4c] ss:$16 sps:$4 sm:$0xff]  }
  0x50   :  { %v83_v12 = vld [vmem:[#allocation2] sm:$0xff]  ;;  %v1917_v17 = vld [vmem:[#allocation5 + $0x48] ss:$16 sps:$4 sm:$0xff]   ;;  %v1918_v19 = vld [vmem:[#allocation5 + $0x6c] ss:$16 sps:$4 sm:$0xff]   ;;  %vm204_vm0 = vcmask 523264  }
  0x51   :  { %v1923_v16 = vld [vmem:[#allocation7 + $0x4] ss:$16 sps:$4 sm:$0xff]   ;;  %v85_v18 = vpack.c.bf16 %v84_v15, %v83_v12  ;;  %v1921_v20 = vld [vmem:[#allocation7] ss:$16 sps:$4 sm:$0xff]   ;;  %v1920_v22 = vld [vmem:[#allocation5 + $0x68] ss:$16 sps:$4 sm:$0xff]  }
  0x52   :  { %211 = vmatpush1.bf16.msra.mxu0 %v1902_v4  ;;  %254 = vmatpush1.bf16.msra.mxu1 %v1914_v13  ;;  %v1929_v21 = vld [vmem:[#allocation7 + $0x24] ss:$16 sps:$4 sm:$0xff]   ;;  %v1926_v23 = vld [vmem:[#allocation7 + $0xc] ss:$16 sps:$4 sm:$0xff]   ;;  %v1927_v24 = vld [vmem:[#allocation7 + $0x20] ss:$16 sps:$4 sm:$0xff]  }
  0x53   :  { %212 = vmatprep.subr.bf16.mxu0 %v1903_v5  ;;  %255 = vmatprep.subr.bf16.mxu1 %v1915_v14  ;;  %v1935_v25 = vld [vmem:[#allocation7 + $0x44] ss:$16 sps:$4 sm:$0xff]   ;;  %v1924_v26 = vld [vmem:[#allocation7 + $0x8] ss:$16 sps:$4 sm:$0xff]   ;;  %v1932_v27 = vld [vmem:[#allocation7 + $0x2c] ss:$16 sps:$4 sm:$0xff]  }
  0x54   :  { %v1933_v28 = vld [vmem:[#allocation7 + $0x40] ss:$16 sps:$4 sm:$0xff]   ;;  %v1941_v29 = vld [vmem:[#allocation7 + $0x64] ss:$16 sps:$4 sm:$0xff]   ;;  %v1930_v30 = vld [vmem:[#allocation7 + $0x28] ss:$16 sps:$4 sm:$0xff]  }
  0x55   :  { %v1938_v31 = vld [vmem:[#allocation7 + $0x4c] ss:$16 sps:$4 sm:$0xff]   ;;  %v1939_v32 = vld [vmem:[#allocation7 + $0x60] ss:$16 sps:$4 sm:$0xff]   ;;  %v1947_v33 = vld [vmem:[#allocation7 + $0x84] ss:$16 sps:$4 sm:$0xff]  }
  0x56   :  { %213 = vmatpush1.bf16.msra.mxu0 %v1905_v6  ;;  %256 = vmatpush1.bf16.msra.mxu1 %v1917_v17  ;;  %v1936_v34 = vld [vmem:[#allocation7 + $0x48] ss:$16 sps:$4 sm:$0xff]   ;;  %v1944_v35 = vld [vmem:[#allocation7 + $0x6c] ss:$16 sps:$4 sm:$0xff]   ;;  %v1945_v36 = vld [vmem:[#allocation7 + $0x80] ss:$16 sps:$4 sm:$0xff]  }
  0x57   :  { %214 = vmatprep.subr.bf16.mxu0 %v1906_v9  ;;  %257 = vmatprep.subr.bf16.mxu1 %v1918_v19  ;;  %v1953_v37 = vld [vmem:[#allocation7 + $0xa4] ss:$16 sps:$4 sm:$0xff]   ;;  %v1942_v38 = vld [vmem:[#allocation7 + $0x68] ss:$16 sps:$4 sm:$0xff]   ;;  %v1950_v39 = vld [vmem:[#allocation7 + $0x8c] ss:$16 sps:$4 sm:$0xff]  }
  0x58   :  { %v1951_v40 = vld [vmem:[#allocation7 + $0xa0] ss:$16 sps:$4 sm:$0xff]   ;;  %v1959_v41 = vld [vmem:[#allocation7 + $0xc4] ss:$16 sps:$4 sm:$0xff]   ;;  %v1948_v42 = vld [vmem:[#allocation7 + $0x88] ss:$16 sps:$4 sm:$0xff]  }
  0x59   :  { %v1956_v43 = vld [vmem:[#allocation7 + $0xac] ss:$16 sps:$4 sm:$0xff]   ;;  %v1957_v44 = vld [vmem:[#allocation7 + $0xc0] ss:$16 sps:$4 sm:$0xff]   ;;  %v1965_v45 = vld [vmem:[#allocation7 + $0xe4] ss:$16 sps:$4 sm:$0xff]  }
  0x5a   :  { %215 = vmatpush1.bf16.msra.mxu0 %v1908_v11  ;;  %258 = vmatpush1.bf16.msra.mxu1 %v1920_v22  ;;  %v1954_v46 = vld [vmem:[#allocation7 + $0xa8] ss:$16 sps:$4 sm:$0xff]   ;;  %v1962_v47 = vld [vmem:[#allocation7 + $0xcc] ss:$16 sps:$4 sm:$0xff]   ;;  %v1963_v48 = vld [vmem:[#allocation7 + $0xe0] ss:$16 sps:$4 sm:$0xff]   ;;  %v104_v22 = vlaneseq }
  0x5b   :  { %1096 = vmatprep.subr.bf16.mxu0 %v1923_v16  ;;  %1182 = vmatprep.subr.bf16.mxu1 %v1926_v23  ;;  %v1971_v49 = vld [vmem:[#allocation7 + $0x104] ss:$16 sps:$4 sm:$0xff]   ;;  %v1960_v50 = vld [vmem:[#allocation7 + $0xc8] ss:$16 sps:$4 sm:$0xff]   ;;  %v1968_v51 = vld [vmem:[#allocation7 + $0xec] ss:$16 sps:$4 sm:$0xff]  }
  0x5c   :  { %v1969_v52 = vld [vmem:[#allocation7 + $0x100] ss:$16 sps:$4 sm:$0xff]   ;;  %v1966_v53 = vld [vmem:[#allocation7 + $0xe8] ss:$16 sps:$4 sm:$0xff]   ;;  %v1974_v54 = vld [vmem:[#allocation7 + $0x10c] ss:$16 sps:$4 sm:$0xff]  }
  0x5d   :  { %1662 = vmatmul.mubr.msk.bf16.vlgmr.msra.gmra.mrb[0].mxu0 %vm204_vm0, %v85_v18  ;;  %1663 = vmatmul.mubr.msk.bf16.vlgmr.msra.gmra.mrb[0].mxu1 %vm204_vm0, %v85_v18  ;;  %v1977_v55 = vld [vmem:[#allocation7 + $0x124] ss:$16 sps:$4 sm:$0xff]   ;;  %v1975_v56 = vld [vmem:[#allocation7 + $0x120] ss:$16 sps:$4 sm:$0xff]   ;;  %v1972_v58 = vld [vmem:[#allocation7 + $0x108] ss:$16 sps:$4 sm:$0xff]  }
  0x5e   :  { %1097 = vmatpush1.bf16.msra.mxu0 %v1921_v20  ;;  %1183 = vmatpush1.bf16.msra.mxu1 %v1924_v26  ;;  %v1983_v57 = vld [vmem:[#allocation7 + $0x144] ss:$16 sps:$4 sm:$0xff]   ;;  %v1980_v59 = vld [vmem:[#allocation7 + $0x12c] ss:$16 sps:$4 sm:$0xff]   ;;  %v1981_v60 = vld [vmem:[#allocation7 + $0x140] ss:$16 sps:$4 sm:$0xff]  }
  0x5f   :  { %1098 = vmatprep.subr.bf16.mxu0 %v1929_v21  ;;  %1184 = vmatprep.subr.bf16.mxu1 %v1932_v27  ;;  %v1989_v61 = vld [vmem:[#allocation7 + $0x164] ss:$16 sps:$4 sm:$0xff]   ;;  %v1978_v62 = vld [vmem:[#allocation7 + $0x128] ss:$16 sps:$4 sm:$0xff]   ;;  %v1986_v63 = vld [vmem:[#allocation7 + $0x14c] ss:$16 sps:$4 sm:$0xff]  }
  0x60   :  { %v1987_v0 = vld [vmem:[#allocation7 + $0x160] ss:$16 sps:$4 sm:$0xff]   ;;  %v1995_v1 = vld [vmem:[#allocation7 + $0x184] ss:$16 sps:$4 sm:$0xff]   ;;  %v1984_v2 = vld [vmem:[#allocation7 + $0x148] ss:$16 sps:$4 sm:$0xff]  }
  0x61   :  { %v1992_v3 = vld [vmem:[#allocation7 + $0x16c] ss:$16 sps:$4 sm:$0xff]   ;;  %v1993_v4 = vld [vmem:[#allocation7 + $0x180] ss:$16 sps:$4 sm:$0xff]   ;;  %v2001_v5 = vld [vmem:[#allocation7 + $0x1a4] ss:$16 sps:$4 sm:$0xff]  }
  0x62   :  { %1099 = vmatpush1.bf16.msra.mxu0 %v1927_v24  ;;  %1185 = vmatpush1.bf16.msra.mxu1 %v1930_v30  ;;  %v1990_v6 = vld [vmem:[#allocation7 + $0x168] ss:$16 sps:$4 sm:$0xff]   ;;  %v1998_v7 = vld [vmem:[#allocation7 + $0x18c] ss:$16 sps:$4 sm:$0xff]   ;;  %v1999_v8 = vld [vmem:[#allocation7 + $0x1a0] ss:$16 sps:$4 sm:$0xff]  }
  0x63   :  { %1100 = vmatprep.subr.bf16.mxu0 %v1935_v25  ;;  %1186 = vmatprep.subr.bf16.mxu1 %v1938_v31  ;;  %v1996_v9 = vld [vmem:[#allocation7 + $0x188] ss:$16 sps:$4 sm:$0xff]   ;;  %v2004_v10 = vld [vmem:[#allocation7 + $0x1ac] ss:$16 sps:$4 sm:$0xff]   ;;  %v2007_v12 = vld [vmem:[#allocation7 + $0x1c4] ss:$16 sps:$4 sm:$0xff]  }
  0x64   :  { %v2002_v11 = vld [vmem:[#allocation7 + $0x1a8] ss:$16 sps:$4 sm:$0xff]   ;;  %v2010_v13 = vld [vmem:[#allocation7 + $0x1cc] ss:$16 sps:$4 sm:$0xff]   ;;  %v2005_v14 = vld [vmem:[#allocation7 + $0x1c0] ss:$16 sps:$4 sm:$0xff]  }
  0x65   :  { %v2008_v15 = vld [vmem:[#allocation7 + $0x1c8] ss:$16 sps:$4 sm:$0xff]   ;;  %v2013_v16 = vld [vmem:[#allocation7 + $0x1e4] ss:$16 sps:$4 sm:$0xff]   ;;  %v2016_v17 = vld [vmem:[#allocation7 + $0x1ec] ss:$16 sps:$4 sm:$0xff]  }
  0x66   :  { %1101 = vmatpush1.bf16.msra.mxu0 %v1933_v28  ;;  %1187 = vmatpush1.bf16.msra.mxu1 %v1936_v34  ;;  %v2011_v18 = vld [vmem:[#allocation7 + $0x1e0] ss:$16 sps:$4 sm:$0xff]   ;;  %v2014_v19 = vld [vmem:[#allocation7 + $0x1e8] ss:$16 sps:$4 sm:$0xff]   ;;  %v2019_v20 = vld [vmem:[#allocation7 + $0x204] ss:$16 sps:$4 sm:$0xff]  }
  0x67   :  { %1102 = vmatprep.subr.bf16.mxu0 %v1941_v29  ;;  %1188 = vmatprep.subr.bf16.mxu1 %v1944_v35  ;;  %v2022_v21 = vld [vmem:[#allocation7 + $0x20c] ss:$16 sps:$4 sm:$0xff]   ;;  %v2381_v23 = vshrl.u32 %v104_v22, 7  ;;  %v102_v25 = vld [vmem:[%s2433_s2] sm:$0xf]  ;;  %s2274_s10 = smov [#allocation10]  }
  0x68   :  { %v2056_v22 = vld [vmem:[#allocation7 + $0x2c8] ss:$16 sps:$4 sm:$0xff]   ;;  %s1632_s13 = sshll.u32 %s2274_s10, 4  ;;  %s1633_s13 = int_to_ptr.vmem [resolvable:$true] %s1632_s13 }
  0x69   :  { %v106_v24 = vsub.s32 0, %v2381_v23  ;;  %v110_v26 = vsub.s32 1, %v2381_v23  ;;  %v114_v29 = vsub.s32 2, %v2381_v23  ;;  %v118_v31 = vsub.s32 3, %v2381_v23  ;;  %p2238_p5 = scmp.lt.s32.totalorder %s1633_s13, %s1633_s13 }
  0x6a   :  { %1103 = vmatpush1.bf16.msra.mxu0 %v1939_v32  ;;  %1189 = vmatpush1.bf16.msra.mxu1 %v1942_v38 }
  0x6b   :  { %1104 = vmatprep.subr.bf16.mxu0 %v1947_v33  ;;  %1190 = vmatprep.subr.bf16.mxu1 %v1950_v39  ;;  %v107_v27 = vrot.slane %v102_v25, %v106_v24  ;;  %v111_v28 = vrot.slane %v102_v25, %v110_v26  ;;  %v115_v38 = vrot.slane %v102_v25, %v114_v29 }
  0x6e   :  { %1105 = vmatpush1.bf16.msra.mxu0 %v1945_v36  ;;  %1191 = vmatpush1.bf16.msra.mxu1 %v1948_v42 }
  0x6f   :  { %1106 = vmatprep.subr.bf16.mxu0 %v1953_v37  ;;  %1192 = vmatprep.subr.bf16.mxu1 %v1956_v43 }
  0x72   :  { %1107 = vmatpush1.bf16.msra.mxu0 %v1951_v40  ;;  %1193 = vmatpush1.bf16.msra.mxu1 %v1954_v46  ;;  %v119_v40 = vrot.slane %v102_v25, %v118_v31  ;;  %v2061_v25 = vld [vmem:[#allocation7 + $0x2e4] ss:$16 sps:$4 sm:$0xff]  }
  0x73   :  { %1108 = vmatprep.subr.bf16.mxu0 %v1959_v41  ;;  %1194 = vmatprep.subr.bf16.mxu1 %v1962_v47 }
  0x76   :  { %1109 = vmatpush1.bf16.msra.mxu0 %v1957_v44  ;;  %1195 = vmatpush1.bf16.msra.mxu1 %v1960_v50  ;;  %v2017_v50 = vld [vmem:[#allocation7 + $0x200] ss:$16 sps:$4 sm:$0xff]  }
  0x77   :  { %1110 = vmatprep.subr.bf16.mxu0 %v1965_v45  ;;  %1196 = vmatprep.subr.bf16.mxu1 %v1968_v51  ;;  %v2020_v51 = vld [vmem:[#allocation7 + $0x208] ss:$16 sps:$4 sm:$0xff]  }
  0x7a   :  { %1111 = vmatpush1.bf16.msra.mxu0 %v1963_v48  ;;  %1197 = vmatpush1.bf16.msra.mxu1 %v1966_v53 }
  0x7b   :  { %1112 = vmatprep.subr.bf16.mxu0 %v1971_v49  ;;  %1198 = vmatprep.subr.bf16.mxu1 %v1974_v54  ;;  %v2025_v54 = vld [vmem:[#allocation7 + $0x224] ss:$16 sps:$4 sm:$0xff]  }
  0x7e   :  { %1113 = vmatpush1.bf16.msra.mxu0 %v1969_v52  ;;  %1199 = vmatpush1.bf16.msra.mxu1 %v1972_v58 }
  0x7f   :  { %1114 = vmatprep.subr.bf16.mxu0 %v1977_v55  ;;  %1200 = vmatprep.subr.bf16.mxu1 %v1980_v59  ;;  %v2028_v55 = vld [vmem:[#allocation7 + $0x22c] ss:$16 sps:$4 sm:$0xff]  }
  0x82   :  { %1115 = vmatpush1.bf16.msra.mxu0 %v1975_v56  ;;  %1201 = vmatpush1.bf16.msra.mxu1 %v1978_v62  ;;  %v2023_v62 = vld [vmem:[#allocation7 + $0x220] ss:$16 sps:$4 sm:$0xff]  }
  0x83   :  { %1116 = vmatprep.subr.bf16.mxu0 %v1983_v57  ;;  %1202 = vmatprep.subr.bf16.mxu1 %v1986_v63  ;;  %v2026_v63 = vld [vmem:[#allocation7 + $0x228] ss:$16 sps:$4 sm:$0xff]  }
  0x86   :  { %1117 = vmatpush1.bf16.msra.mxu0 %v1981_v60  ;;  %1203 = vmatpush1.bf16.msra.mxu1 %v1984_v2  ;;  %v2034_v2 = vld [vmem:[#allocation7 + $0x24c] ss:$16 sps:$4 sm:$0xff]  }
  0x87   :  { %1118 = vmatprep.subr.bf16.mxu0 %v1989_v61  ;;  %1204 = vmatprep.subr.bf16.mxu1 %v1992_v3 }
  0x8a   :  { %1119 = vmatpush1.bf16.msra.mxu0 %v1987_v0  ;;  %1205 = vmatpush1.bf16.msra.mxu1 %v1990_v6  ;;  %v2032_v6 = vld [vmem:[#allocation7 + $0x248] ss:$16 sps:$4 sm:$0xff]  }
  0x8b   :  { %1120 = vmatprep.subr.bf16.mxu0 %v1995_v1  ;;  %1206 = vmatprep.subr.bf16.mxu1 %v1998_v7  ;;  %v2031_v1 = vld [vmem:[#allocation7 + $0x244] ss:$16 sps:$4 sm:$0xff]  }
  0x8c   :  { %v2037_v7 = vld [vmem:[#allocation7 + $0x264] ss:$16 sps:$4 sm:$0xff]  }
  0x8e   :  { %1121 = vmatpush1.bf16.msra.mxu0 %v1993_v4  ;;  %1207 = vmatpush1.bf16.msra.mxu1 %v1996_v9  ;;  %v2035_v9 = vld [vmem:[#allocation7 + $0x260] ss:$16 sps:$4 sm:$0xff]  }
  0x8f   :  { %1122 = vmatprep.subr.bf16.mxu0 %v2001_v5  ;;  %1208 = vmatprep.subr.bf16.mxu1 %v2004_v10  ;;  %v2029_v5 = vld [vmem:[#allocation7 + $0x240] ss:$16 sps:$4 sm:$0xff]   ;;  %v2038_v10 = vld [vmem:[#allocation7 + $0x268] ss:$16 sps:$4 sm:$0xff]  }
  0x92   :  { %1123 = vmatpush1.bf16.msra.mxu0 %v1999_v8  ;;  %1209 = vmatpush1.bf16.msra.mxu1 %v2002_v11  ;;  %v2040_v8 = vld [vmem:[#allocation7 + $0x26c] ss:$16 sps:$4 sm:$0xff]   ;;  %v2043_v11 = vld [vmem:[#allocation7 + $0x284] ss:$16 sps:$4 sm:$0xff]  }
  0x93   :  { %1124 = vmatprep.subr.bf16.mxu0 %v2007_v12  ;;  %1210 = vmatprep.subr.bf16.mxu1 %v2010_v13  ;;  %v2046_v12 = vld [vmem:[#allocation7 + $0x28c] ss:$16 sps:$4 sm:$0xff]   ;;  %v2041_v13 = vld [vmem:[#allocation7 + $0x280] ss:$16 sps:$4 sm:$0xff]  }
  0x96   :  { %1125 = vmatpush1.bf16.msra.mxu0 %v2005_v14  ;;  %1211 = vmatpush1.bf16.msra.mxu1 %v2008_v15  ;;  %v2044_v14 = vld [vmem:[#allocation7 + $0x288] ss:$16 sps:$4 sm:$0xff]   ;;  %v2049_v15 = vld [vmem:[#allocation7 + $0x2a4] ss:$16 sps:$4 sm:$0xff]  }
  0x97   :  { %1126 = vmatprep.subr.bf16.mxu0 %v2013_v16  ;;  %1212 = vmatprep.subr.bf16.mxu1 %v2016_v17  ;;  %v2052_v16 = vld [vmem:[#allocation7 + $0x2ac] ss:$16 sps:$4 sm:$0xff]   ;;  %v2047_v17 = vld [vmem:[#allocation7 + $0x2a0] ss:$16 sps:$4 sm:$0xff]  }
  0x9a   :  { %1127 = vmatpush1.bf16.msra.mxu0 %v2011_v18  ;;  %1213 = vmatpush1.bf16.msra.mxu1 %v2014_v19  ;;  %v2050_v18 = vld [vmem:[#allocation7 + $0x2a8] ss:$16 sps:$4 sm:$0xff]   ;;  %v2055_v19 = vld [vmem:[#allocation7 + $0x2c4] ss:$16 sps:$4 sm:$0xff]  }
  0x9b   :  { %1139 = vmatprep.subr.bf16.mxu0 %v2019_v20  ;;  %1225 = vmatprep.subr.bf16.mxu1 %v2022_v21  ;;  %v2058_v20 = vld [vmem:[#allocation7 + $0x2cc] ss:$16 sps:$4 sm:$0xff]   ;;  %v2053_v21 = vld [vmem:[#allocation7 + $0x2c0] ss:$16 sps:$4 sm:$0xff]  }
 0x130   :  { %v242_v30 = vpop.f32.mrb[0].mxu0  ;;  %v285_v45 = vpop.f32.mrb[0].mxu1 }
 0x131   :  { %v243_v32 = vadd.f32 %v242_v30, %v107_v27  ;;  %v244_v33 = vpop.f32.mrb[1].mxu0  ;;  %v286_v47 = vadd.f32 %v285_v45, %v115_v38  ;;  %v287_v48 = vpop.f32.mrb[1].mxu1  ;;  %v2062_v30 = vld [vmem:[#allocation7 + $0x2e8] ss:$16 sps:$4 sm:$0xff]   ;;  %v2088_v45 = vld [vmem:[#allocation7 + $0x36c] ss:$16 sps:$4 sm:$0xff]  }
 0x132   :  { %v245_v34 = vadd.f32 %v244_v33, %v111_v28  ;;  %v246_v35 = vpop.f32.mrb[2].mxu0  ;;  %v288_v52 = vadd.f32 %v287_v48, %v119_v40  ;;  %v289_v53 = vpop.f32.mrb[2].mxu1  ;;  %v2070_v33 = vld [vmem:[#allocation7 + $0x30c] ss:$16 sps:$4 sm:$0xff]   ;;  %v2091_v48 = vld [vmem:[#allocation7 + $0x384] ss:$16 sps:$4 sm:$0xff]  }
 0x133   :  { %v247_v36 = vadd.f32 %v246_v35, %v107_v27  ;;  %v248_v37 = vpop.f32.mrb[3].mxu0  ;;  %v294_v41 = vmax.f32 %v243_v32, 0.0  ;;  %v296_v56 = vmax.f32 %v286_v47, 0.0  ;;  %v290_v57 = vadd.f32 %v289_v53, %v115_v38  ;;  %v291_v58 = vpop.f32.mrb[3].mxu1  ;;  %v2064_v27 = vld [vmem:[#allocation7 + $0x2ec] ss:$16 sps:$4 sm:$0xff]  }
 0x134   :  { %v249_v39 = vadd.f32 %v248_v37, %v111_v28  ;;  %v295_v43 = vmax.f32 %v245_v34, 0.0  ;;  %v297_v59 = vmax.f32 %v288_v52, 0.0  ;;  %v292_v60 = vadd.f32 %v291_v58, %v119_v40  ;;  %v2059_v28 = vld [vmem:[#allocation7 + $0x2e0] ss:$16 sps:$4 sm:$0xff]   ;;  %v2067_v32 = vld [vmem:[#allocation7 + $0x304] ss:$16 sps:$4 sm:$0xff]  }
 0x135   :  { %v298_v42 = vmax.f32 %v247_v36, 0.0  ;;  %v300_v61 = vmax.f32 %v290_v57, 0.0  ;;  %v2065_v34 = vld [vmem:[#allocation7 + $0x300] ss:$16 sps:$4 sm:$0xff]   ;;  %v2068_v35 = vld [vmem:[#allocation7 + $0x308] ss:$16 sps:$4 sm:$0xff]  }
 0x136   :  { %v299_v44 = vmax.f32 %v249_v39, 0.0  ;;  %v301_v0 = vmax.f32 %v292_v60, 0.0  ;;  %v2073_v36 = vld [vmem:[#allocation7 + $0x324] ss:$16 sps:$4 sm:$0xff]   ;;  %v2076_v37 = vld [vmem:[#allocation7 + $0x32c] ss:$16 sps:$4 sm:$0xff]  }
 0x137   :  { %v302_v46 = vpack.c.bf16 %v298_v42, %v294_v41  ;;  %v2398_v3 = vpack.c.bf16 %v300_v61, %v296_v56  ;;  %v2071_v38 = vld [vmem:[#allocation7 + $0x320] ss:$16 sps:$4 sm:$0xff]   ;;  %v2074_v39 = vld [vmem:[#allocation7 + $0x328] ss:$16 sps:$4 sm:$0xff]   ;;  %v2079_v40 = vld [vmem:[#allocation7 + $0x344] ss:$16 sps:$4 sm:$0xff]  }
 0x138   :  { %v303_v49 = vpack.c.bf16 %v299_v44, %v295_v43  ;;  %v305_v4 = vpack.c.bf16 %v301_v0, %v297_v59  ;;  %v2082_v41 = vld [vmem:[#allocation7 + $0x34c] ss:$16 sps:$4 sm:$0xff]   ;;  %v2077_v42 = vld [vmem:[#allocation7 + $0x340] ss:$16 sps:$4 sm:$0xff]   ;;  %v2080_v43 = vld [vmem:[#allocation7 + $0x348] ss:$16 sps:$4 sm:$0xff]  }
 0x139   :  { %v2085_v44 = vld [vmem:[#allocation7 + $0x364] ss:$16 sps:$4 sm:$0xff]   ;;  %v2086_v47 = vld [vmem:[#allocation7 + $0x368] ss:$16 sps:$4 sm:$0xff]   ;;  %v2100_v53 = vld [vmem:[#allocation7 + $0x3ac] ss:$16 sps:$4 sm:$0xff]  }
 0x13a   :  { %1128 = vmatprep.mubr.bf16.mxu0 %v303_v49  ;;  %1214 = vmatprep.mubr.bf16.mxu1 %v303_v49  ;;  %v2094_v49 = vld [vmem:[#allocation7 + $0x38c] ss:$16 sps:$4 sm:$0xff]   ;;  %v2097_v52 = vld [vmem:[#allocation7 + $0x3a4] ss:$16 sps:$4 sm:$0xff]   ;;  %v2101_v58 = vld [vmem:[#allocation7 + $0x3c0] ss:$16 sps:$4 sm:$0xff]  }
 0x13b   :  { %1129 = vmatmul.mubr.bf16.vlgmr.msra.gmra.mrb[4].mxu0 %v302_v46  ;;  %1215 = vmatmul.mubr.bf16.vlgmr.msra.gmra.mrb[4].mxu1 %v302_v46  ;;  %v2083_v46 = vld [vmem:[#allocation7 + $0x360] ss:$16 sps:$4 sm:$0xff]   ;;  %v2103_v56 = vld [vmem:[#allocation7 + $0x3c4] ss:$16 sps:$4 sm:$0xff]   ;;  %v2106_v57 = vld [vmem:[#allocation7 + $0x3cc] ss:$16 sps:$4 sm:$0xff]  }
 0x13c   :  { %1140 = vmatpush1.bf16.msra.mxu0 %v2017_v50  ;;  %1226 = vmatpush1.bf16.msra.mxu1 %v2020_v51  ;;  %v2089_v50 = vld [vmem:[#allocation7 + $0x380] ss:$16 sps:$4 sm:$0xff]   ;;  %v2092_v51 = vld [vmem:[#allocation7 + $0x388] ss:$16 sps:$4 sm:$0xff]   ;;  %v2109_v60 = vld [vmem:[#allocation7 + $0x3e4] ss:$16 sps:$4 sm:$0xff]  }
 0x13d   :  { %1141 = vmatprep.subr.bf16.mxu0 %v2025_v54  ;;  %1227 = vmatprep.subr.bf16.mxu1 %v2028_v55  ;;  %v2095_v54 = vld [vmem:[#allocation7 + $0x3a0] ss:$16 sps:$4 sm:$0xff]   ;;  %v2098_v55 = vld [vmem:[#allocation7 + $0x3a8] ss:$16 sps:$4 sm:$0xff]   ;;  %v2112_v61 = vld [vmem:[#allocation7 + $0x3ec] ss:$16 sps:$4 sm:$0xff]  }
 0x13e   :  { %1171 = vmatprep.mubr.bf16.mxu0 %v305_v4  ;;  %1257 = vmatprep.mubr.bf16.mxu1 %v305_v4  ;;  %v2104_v59 = vld [vmem:[#allocation7 + $0x3c8] ss:$16 sps:$4 sm:$0xff]   ;;  %v2113_v0 = vld [vmem:[#allocation8 + $0x40] sm:$0xff]  }
 0x13f   :  { %v2116_v4 = vld [vmem:[#allocation8 + $0x80] sm:$0xff]  }
 0x140   :  { %1142 = vmatpush1.bf16.msra.mxu0 %v2023_v62  ;;  %1228 = vmatpush1.bf16.msra.mxu1 %v2026_v63  ;;  %v2107_v62 = vld [vmem:[#allocation7 + $0x3e0] ss:$16 sps:$4 sm:$0xff]   ;;  %v2110_v63 = vld [vmem:[#allocation7 + $0x3e8] ss:$16 sps:$4 sm:$0xff]  }
 0x141   :  { %1143 = vmatprep.subr.bf16.mxu0 %v2031_v1  ;;  %1229 = vmatprep.subr.bf16.mxu1 %v2034_v2  ;;  %v2114_v1 = vld [vmem:[#allocation8 + $0xc0] sm:$0xff]  }
 0x142   :  { %v2115_v2 = vld [vmem:[#allocation8] sm:$0xff]  }
 0x144   :  { %1144 = vmatpush1.bf16.msra.mxu0 %v2029_v5  ;;  %1230 = vmatpush1.bf16.msra.mxu1 %v2032_v6  ;;  %v2117_v5 = vld [vmem:[#allocation8 + $0x48] sm:$0xff]  }
 0x145   :  { %1145 = vmatprep.subr.bf16.mxu0 %v2037_v7  ;;  %1231 = vmatprep.subr.bf16.mxu1 %v2040_v8  ;;  %v2118_v6 = vld [vmem:[#allocation8 + $0xc8] sm:$0xff]  }
 0x146   :  { %v2119_v7 = vld [vmem:[#allocation8 + $0x8] sm:$0xff]  }
 0x147   :  { %v2120_v8 = vld [vmem:[#allocation8 + $0x88] sm:$0xff]  }
 0x148   :  { %1146 = vmatpush1.bf16.msra.mxu0 %v2035_v9  ;;  %1232 = vmatpush1.bf16.msra.mxu1 %v2038_v10  ;;  %v2121_v9 = vld [vmem:[#allocation8 + $0x50] sm:$0xff]  }
 0x149   :  { %1147 = vmatprep.subr.bf16.mxu0 %v2043_v11  ;;  %1233 = vmatprep.subr.bf16.mxu1 %v2046_v12  ;;  %v2122_v10 = vld [vmem:[#allocation8 + $0xd0] sm:$0xff]  }
 0x14a   :  { %v2123_v11 = vld [vmem:[#allocation8 + $0x10] sm:$0xff]  }
 0x14b   :  { %v2124_v12 = vld [vmem:[#allocation8 + $0x90] sm:$0xff]  }
 0x14c   :  { %1148 = vmatpush1.bf16.msra.mxu0 %v2041_v13  ;;  %1234 = vmatpush1.bf16.msra.mxu1 %v2044_v14  ;;  %v2125_v13 = vld [vmem:[#allocation8 + $0x58] sm:$0xff]  }
 0x14d   :  { %1149 = vmatprep.subr.bf16.mxu0 %v2049_v15  ;;  %1235 = vmatprep.subr.bf16.mxu1 %v2052_v16  ;;  %v2126_v14 = vld [vmem:[#allocation8 + $0xd8] sm:$0xff]   ;;  %v2129_v16 = vld [vmem:[#allocation8 + $0x60] sm:$0xff]  }
 0x14e   :  { %v2127_v15 = vld [vmem:[#allocation8 + $0x18] sm:$0xff]  }
 0x150   :  { %1150 = vmatpush1.bf16.msra.mxu0 %v2047_v17  ;;  %1236 = vmatpush1.bf16.msra.mxu1 %v2050_v18  ;;  %v2130_v17 = vld [vmem:[#allocation8 + $0xe0] sm:$0xff]  }
 0x151   :  { %1151 = vmatprep.subr.bf16.mxu0 %v2055_v19  ;;  %1237 = vmatprep.subr.bf16.mxu1 %v2058_v20  ;;  %v2131_v18 = vld [vmem:[#allocation8 + $0x20] sm:$0xff]   ;;  %v2133_v20 = vld [vmem:[#allocation8 + $0x68] sm:$0xff]  }
 0x152   :  { %v2132_v19 = vld [vmem:[#allocation8 + $0xa0] sm:$0xff]  }
 0x154   :  { %1152 = vmatpush1.bf16.msra.mxu0 %v2053_v21  ;;  %1238 = vmatpush1.bf16.msra.mxu1 %v2056_v22  ;;  %v2134_v21 = vld [vmem:[#allocation8 + $0xe8] sm:$0xff]  }
 0x155   :  { %1153 = vmatprep.subr.bf16.mxu0 %v2061_v25  ;;  %1239 = vmatprep.subr.bf16.mxu1 %v2064_v27  ;;  %v2135_v22 = vld [vmem:[#allocation8 + $0x28] sm:$0xff]   ;;  %v2137_v27 = vld [vmem:[#allocation8 + $0x70] sm:$0xff]  }
 0x156   :  { %v2136_v25 = vld [vmem:[#allocation8 + $0xa8] sm:$0xff]  }
 0x158   :  { %1154 = vmatpush1.bf16.msra.mxu0 %v2059_v28  ;;  %1240 = vmatpush1.bf16.msra.mxu1 %v2062_v30  ;;  %v2138_v28 = vld [vmem:[#allocation8 + $0xf0] sm:$0xff]  }
 0x159   :  { %1155 = vmatprep.subr.bf16.mxu0 %v2067_v32  ;;  %1241 = vmatprep.subr.bf16.mxu1 %v2070_v33  ;;  %v2139_v30 = vld [vmem:[#allocation8 + $0x30] sm:$0xff]   ;;  %v2141_v33 = vld [vmem:[#allocation8 + $0x78] sm:$0xff]  }
 0x15a   :  { %v2140_v32 = vld [vmem:[#allocation8 + $0xb0] sm:$0xff]  }
 0x15c   :  { %1156 = vmatpush1.bf16.msra.mxu0 %v2065_v34  ;;  %1242 = vmatpush1.bf16.msra.mxu1 %v2068_v35  ;;  %v2142_v34 = vld [vmem:[#allocation8 + $0xf8] sm:$0xff]  }
 0x15d   :  { %1157 = vmatprep.subr.bf16.mxu0 %v2073_v36  ;;  %1243 = vmatprep.subr.bf16.mxu1 %v2076_v37  ;;  %v2143_v35 = vld [vmem:[#allocation8 + $0x38] sm:$0xff]   ;;  %v434_v37 = vld [vmem:[%s2435_s4] sm:$0xf] }
 0x15e   :  { %v2144_v36 = vld [vmem:[#allocation8 + $0xb8] sm:$0xff]  }
 0x160   :  { %1158 = vmatpush1.bf16.msra.mxu0 %v2071_v38  ;;  %1244 = vmatpush1.bf16.msra.mxu1 %v2074_v39  ;;  %v439_v38 = vrot.slane %v434_v37, %v106_v24  ;;  %v447_v39 = vrot.slane %v434_v37, %v114_v29 }
 0x161   :  { %1159 = vmatprep.subr.bf16.mxu0 %v2079_v40  ;;  %1245 = vmatprep.subr.bf16.mxu1 %v2082_v41  ;;  %v443_v40 = vrot.slane %v434_v37, %v110_v26  ;;  %v451_v41 = vrot.slane %v434_v37, %v118_v31 }
 0x164   :  { %1160 = vmatpush1.bf16.msra.mxu0 %v2077_v42  ;;  %1246 = vmatpush1.bf16.msra.mxu1 %v2080_v43 }
 0x165   :  { %1161 = vmatprep.subr.bf16.mxu0 %v2085_v44  ;;  %1247 = vmatprep.subr.bf16.mxu1 %v2088_v45 }
 0x168   :  { %1162 = vmatpush1.bf16.msra.mxu0 %v2083_v46  ;;  %1248 = vmatpush1.bf16.msra.mxu1 %v2086_v47 }
 0x169   :  { %1163 = vmatprep.subr.bf16.mxu0 %v2091_v48  ;;  %1249 = vmatprep.subr.bf16.mxu1 %v2094_v49 }
 0x16c   :  { %1164 = vmatpush1.bf16.msra.mxu0 %v2089_v50  ;;  %1250 = vmatpush1.bf16.msra.mxu1 %v2092_v51 }
 0x16d   :  { %1165 = vmatprep.subr.bf16.mxu0 %v2097_v52  ;;  %1251 = vmatprep.subr.bf16.mxu1 %v2100_v53 }
 0x170   :  { %1166 = vmatpush1.bf16.msra.mxu0 %v2095_v54  ;;  %1252 = vmatpush1.bf16.msra.mxu1 %v2098_v55 }
 0x171   :  { %1167 = vmatprep.subr.bf16.mxu0 %v2103_v56  ;;  %1253 = vmatprep.subr.bf16.mxu1 %v2106_v57 }
 0x174   :  { %1168 = vmatpush1.bf16.msra.mxu0 %v2101_v58  ;;  %1254 = vmatpush1.bf16.msra.mxu1 %v2104_v59 }
 0x175   :  { %1169 = vmatprep.subr.bf16.mxu0 %v2109_v60  ;;  %1255 = vmatprep.subr.bf16.mxu1 %v2112_v61 }
 0x178   :  { %1170 = vmatpush1.bf16.msra.mxu0 %v2107_v62  ;;  %1256 = vmatpush1.bf16.msra.mxu1 %v2110_v63 }
 0x179   :  { %1825 = vmatprep.subr.bf16.mxu0 %v2113_v0  ;;  %1847 = vmatprep.subr.bf16.mxu1 %v2114_v1 }
 0x17b   :  { %1172 = vmatmul.mubr.bf16.vlgmr.msra.gmra.mrb[4].mxu0 %v2398_v3  ;;  %1258 = vmatmul.mubr.bf16.vlgmr.msra.gmra.mrb[4].mxu1 %v2398_v3  ;;  %v2128_v3 = vld [vmem:[#allocation8 + $0x98] sm:$0xff]  }
 0x17c   :  { %1826 = vmatpush3.bf16.msra.mxu0 %v2115_v2  ;;  %1848 = vmatpush3.bf16.msra.mxu1 %v2116_v4  ;;  %v1792_v4 = vld [vmem:[%s2437_s6] ss:$0 sm:$0xff]  ;;  %s2233_s6 = scalar_lea.vmem %s1633_s13, 256 }
 0x17d   :  { %1827 = vmatprep.subr.bf16.mxu0 %v2117_v5  ;;  %1849 = vmatprep.subr.bf16.mxu1 %v2118_v6  ;;  %p2234_p4 = scmp.ne.s32.totalorder %s1633_s13, %s2233_s6  ;;  %p2239_p6 = scmp.lt.s32.totalorder %s2233_s6, %s2233_s6 }
 0x17f   :  { %p2240_p7 = por %p2239_p6, %p2238_p5 }
 0x180   :  { %1828 = vmatpush3.bf16.msra.mxu0 %v2119_v7  ;;  %1850 = vmatpush3.bf16.msra.mxu1 %v2120_v8 }
 0x181   :  { %1829 = vmatprep.subr.bf16.mxu0 %v2121_v9  ;;  %1851 = vmatprep.subr.bf16.mxu1 %v2122_v10  ;;  %p2241_p8 = pnand %p2240_p7, %p2234_p4 }
 0x184   :  { %1830 = vmatpush3.bf16.msra.mxu0 %v2123_v11  ;;  %1852 = vmatpush3.bf16.msra.mxu1 %v2124_v12 }
 0x185   :  { %1831 = vmatprep.subr.bf16.mxu0 %v2125_v13  ;;  %1853 = vmatprep.subr.bf16.mxu1 %v2126_v14 }
 0x188   :  { %1832 = vmatpush3.bf16.msra.mxu0 %v2127_v15  ;;  %1854 = vmatpush3.bf16.msra.mxu1 %v2128_v3 }
 0x189   :  { %1833 = vmatprep.subr.bf16.mxu0 %v2129_v16  ;;  %1855 = vmatprep.subr.bf16.mxu1 %v2130_v17 }
 0x18c   :  { %1834 = vmatpush3.bf16.msra.mxu0 %v2131_v18  ;;  %1856 = vmatpush3.bf16.msra.mxu1 %v2132_v19 }
 0x18d   :  { %1835 = vmatprep.subr.bf16.mxu0 %v2133_v20  ;;  %1857 = vmatprep.subr.bf16.mxu1 %v2134_v21 }
 0x190   :  { %1836 = vmatpush3.bf16.msra.mxu0 %v2135_v22  ;;  %1858 = vmatpush3.bf16.msra.mxu1 %v2136_v25 }
 0x191   :  { %1837 = vmatprep.subr.bf16.mxu0 %v2137_v27  ;;  %1859 = vmatprep.subr.bf16.mxu1 %v2138_v28 }
 0x194   :  { %1838 = vmatpush3.bf16.msra.mxu0 %v2139_v30  ;;  %1860 = vmatpush3.bf16.msra.mxu1 %v2140_v32 }
 0x195   :  { %1839 = vmatprep.subr.bf16.mxu0 %v2141_v33  ;;  %1861 = vmatprep.subr.bf16.mxu1 %v2142_v34 }
 0x198   :  { %1840 = vmatpush3.bf16.msra.mxu0 %v2143_v35  ;;  %1862 = vmatpush3.bf16.msra.mxu1 %v2144_v36 }
 0x24e   :  { %v1173_v42 = vpop.f32.mrb[4].mxu0  ;;  %v1259_v43 = vpop.f32.mrb[4].mxu1 }
 0x24f   :  { %v1869_v44 = vadd.f32 %v1173_v42, %v439_v38  ;;  %v1873_v45 = vadd.f32 %v1259_v43, %v447_v39  ;;  %v1175_v46 = vpop.f32.mrb[5].mxu0  ;;  %v1261_v47 = vpop.f32.mrb[5].mxu1 }
 0x250   :  { %v1870_v48 = vadd.f32 %v1175_v46, %v443_v40  ;;  %v1874_v49 = vadd.f32 %v1261_v47, %v451_v41  ;;  %v1177_v50 = vpop.f32.mrb[6].mxu0  ;;  %v1263_v51 = vpop.f32.mrb[6].mxu1 }
 0x251   :  { %v1871_v24 = vadd.f32 %v1177_v50, %v439_v38  ;;  %v1875_v52 = vadd.f32 %v1263_v51, %v447_v39  ;;  %v1179_v53 = vpop.f32.mrb[7].mxu0  ;;  %v1265_v29 = vpop.f32.mrb[7].mxu1  ;;  %v1268_v26 = vmax.f32 %v1869_v44, 0.0  ;;  %v1270_v56 = vmax.f32 %v1873_v45, 0.0 }
 0x252   :  { %v1872_v54 = vadd.f32 %v1179_v53, %v443_v40  ;;  %v1876_v55 = vadd.f32 %v1265_v29, %v451_v41  ;;  %v1269_v57 = vmax.f32 %v1870_v48, 0.0  ;;  %v1271_v58 = vmax.f32 %v1874_v49, 0.0 }
 0x253   :  { %v1272_v23 = vmax.f32 %v1871_v24, 0.0  ;;  %v1274_v31 = vmax.f32 %v1875_v52, 0.0 }
 0x254   :  { %v1273_v59 = vmax.f32 %v1872_v54, 0.0  ;;  %v1275_v60 = vmax.f32 %v1876_v55, 0.0 }
 0x255   :  { %v1276_v61 = vpack.c.bf16 %v1272_v23, %v1268_v26  ;;  %v1278_v62 = vpack.c.bf16 %v1274_v31, %v1270_v56 }
 0x256   :  { %v1277_v63 = vpack.c.bf16 %v1273_v59, %v1269_v57  ;;  %v1279_v0 = vpack.c.bf16 %v1275_v60, %v1271_v58 }
 0x258   :  { %1575 = vmatprep.mubr.bf16.mxu0 %v1277_v63  ;;  %1616 = vmatprep.mubr.bf16.mxu1 %v1279_v0 }
 0x259   :  { %1576 = vmatmul.mubr.bf16.vlgmr.msra.gmra.mrb[8].mxu0 %v1276_v61  ;;  %1617 = vmatmul.mubr.bf16.vlgmr.msra.gmra.mrb[8].mxu1 %v1278_v62 }
 0x32c   :  { %v1841_v1 = vpop.f32.mrb[8].mxu0  ;;  %v1863_v2 = vpop.f32.mrb[8].mxu1 }
 0x32d   :  { %v1842_v5 = vpop.f32.mrb[9].mxu0  ;;  %v1864_v6 = vpop.f32.mrb[9].mxu1 }
 0x32e   :  { %v1843_v7 = vadd.f32 %v1842_v5, %v1841_v1  ;;  %v1865_v8 = vadd.f32 %v1864_v6, %v1863_v2  ;;  %v1844_v9 = vpop.f32.mrb[10].mxu0  ;;  %v1866_v10 = vpop.f32.mrb[10].mxu1 }
 0x32f   :  { %v1845_v11 = vpop.f32.mrb[11].mxu0  ;;  %v1867_v12 = vpop.f32.mrb[11].mxu1 }
 0x330   :  { %v1578_v13 = vadd.f32 %v1843_v7, %v1792_v4  ;;  %v1846_v14 = vadd.f32 %v1845_v11, %v1844_v9  ;;  %v1868_v15 = vadd.f32 %v1867_v12, %v1866_v10 }
 0x332   :  { %v1619_v3 = vadd.f32 %v1865_v8, %v1578_v13  ;;  %v1581_v16 = vadd.f32 %v1846_v14, %v1792_v4 }
 0x334   :  { %1625 = vst [vmem:[#allocation10] sm:$0xff] %v1619_v3  ;;  %v1622_v17 = vadd.f32 %v1868_v15, %v1581_v16 }
 0x336   :  { %1626 = vst [vmem:[#allocation10 + $0x8] sm:$0xff] %v1622_v17 }
 0x337   :  { %2244 = shalt.err (!%p2241_p8)
}
 0x338   :  { %s2245_s17 = scalar_lea.hbm %s2438_s7, 256 }
 0x339   :  { %p2246_p9 = scmp.ne.s32.totalorder %s2438_s7, %s2245_s17  ;;  %p2249_p10 = scmp.lt.u32.totalorder %s2245_s17, %s2438_s7 }
 0x33b   :  { %p2251_p11 = pnand %p2249_p10, %p2246_p9 }
 0x33d   :  { %2254 = shalt.err (!%p2251_p11)
}
 0x33e   :  { %1638 = dma.vmem_to_hbm [thread:$0]  %s1633_s13, 256, %s2438_s7, [#allocation4], %s2267_s1, %s2267_s1, %s2268_s25  }
 0x33f   :  { %2261 = dma.done.wait [#allocation4], 256  }
 0x340   :  { %2262 = vsyncadd [#allocation4], 4294967040 }
 0x341   :  { %1642 = vsyncpa [#allocation3], 1 }
 0x342   :  { %1643 = vsyncpa [#allocation6], 1 }
 0x343   :  { %1644 = vsyncpa [#allocation9], 1 }
 0x344   :  { %1645 = vsyncpa [#allocation4], 1 }

</bundles_post_ra>
